<compile_context>
chip_gen: v7x
topology: tpu7x:2x2x1
jax: 0.10.0
libtpu: 0.0.40
codegen_flags: <defaults>
</compile_context>

<pallas_src>
import jax
import jax.numpy as jnp
from jax.experimental import pallas as pl
from jax.experimental.pallas import tpu as pltpu


def _round_up(x, m):
    return ((x + m - 1) // m) * m


def linear_kernel(w_ref, b_ref, x_ref, o_ref):
    """y[n, :] = b[n] + sum_k w[n, k] * x[k, :]   (batch on the lane axis).

    w_ref: SMEM (out_f, in_f)    -- 6 scalar weights
    b_ref: SMEM (out_f,)         -- 3 scalar biases
    x_ref: VMEM (in_f, block_b)  -- activations, batch-major on lanes
    o_ref: VMEM (out_f, block_b) -- output, batch-major on lanes
    """
    out_f, in_f = w_ref.shape
    rows = []
    for n in range(out_f):
        acc = b_ref[n].astype(jnp.float32)              # scalar (SMEM path)
        for k in range(in_f):
            # scalar * full-lane row: pure VPU FMA, f32 accumulation.
            acc = acc + w_ref[n, k] * x_ref[k:k + 1, :].astype(jnp.float32)
        rows.append(acc)                                 # (1, block_b) f32
    # Single lane-dense store of the whole (out_f, block_b) tile.
    o_ref[...] = jnp.concatenate(rows, axis=0).astype(o_ref.dtype)


def spiral_model_forward(x, weight, bias, *, block_b=8192):
    """nn.Linear semantics: y = x @ weight.T + bias.

    x: (B, in_f), weight: (out_f, in_f), bias: (out_f,)  ->  (B, out_f)
    """
    B, in_f = x.shape
    out_f = weight.shape[0]

    # Put batch on the lane (last) axis; pad it to a lane-aligned block size.
    x_t = x.T                                            # (in_f, B)
    blk = min(block_b, _round_up(B, 128))
    B_pad = _round_up(B, blk)
    if B_pad != B:
        x_t = jnp.pad(x_t, ((0, 0), (0, B_pad - B)))

    smem = pltpu.MemorySpace.SMEM
    y_t = pl.pallas_call(
        linear_kernel,
        out_shape=jax.ShapeDtypeStruct((out_f, B_pad), x.dtype),
        grid=(B_pad // blk,),
        in_specs=[
            pl.BlockSpec(memory_space=smem),                  # weight (3, 2)
            pl.BlockSpec(memory_space=smem),                  # bias   (3,)
            pl.BlockSpec((in_f, blk), lambda i: (0, i)),      # x^T, batch-tiled
        ],
        out_specs=pl.BlockSpec((out_f, blk), lambda i: (0, i)),
        compiler_params=pltpu.CompilerParams(
            dimension_semantics=("parallel",)),               # v7x: 2 TCs
    )(weight, bias, x_t)

    return y_t[:, :B].T                                   # back to (B, out_f)


if __name__ == "__main__":
    key = jax.random.PRNGKey(0)
    k_x, k_w, k_b = jax.random.split(key, 3)

    in_features, out_features = 2, 3
    batch = 8

    # Deterministic init matching nn.Linear default: U(-1/sqrt(in), 1/sqrt(in))
    bound = 1.0 / (in_features ** 0.5)
    weight = jax.random.uniform(
        k_w, (out_features, in_features), jnp.float32, -bound, bound
    )
    bias = jax.random.uniform(k_b, (out_features,), jnp.float32, -bound, bound)

    x = jax.random.normal(k_x, (batch, in_features), jnp.float32)

    y = spiral_model_forward(x, weight, bias)
    y = jax.block_until_ready(y)

    # Reference check against plain JAX
    y_ref = x @ weight.T + bias
    assert y.shape == (batch, out_features)
    assert jnp.allclose(y, y_ref, atol=1e-5), "mismatch vs reference"

    print("KERNEL_OK")
</pallas_src>

<mosaic_0001>
module attributes {stable_mosaic.version = 11 : i64} {
  func.func @linear_kernel(%arg0: i32, %arg1: memref<3x2xf32, #tpu.memory_space<smem>>, %arg2: memref<3xf32, #tpu.memory_space<smem>>, %arg3: memref<2x128xf32, #tpu.memory_space<vmem>>, %arg4: memref<3x128xf32, #tpu.memory_space<vmem>>) attributes {dimension_semantics = [#tpu.dimension_semantics<parallel>], iteration_bounds = array<i64: 1>, scalar_prefetch = 0 : i64, scratch_operands = 0 : i64, tpu.core_type = #tpu.core_type<tc>, window_params = [{transform_indices = @transform_0, window_bounds = array<i64: 3, 2>}, {transform_indices = @transform_1, window_bounds = array<i64: 3>}, {transform_indices = @transform_2, window_bounds = array<i64: 2, 128>}, {transform_indices = @transform_3, window_bounds = array<i64: 3, 128>}]} {
    %c0 = arith.constant 0 : index
    %0 = memref.load %arg2[%c0] : memref<3xf32, #tpu.memory_space<smem>>
    %c0_0 = arith.constant 0 : index
    %c0_1 = arith.constant 0 : index
    %1 = memref.load %arg1[%c0_0, %c0_1] : memref<3x2xf32, #tpu.memory_space<smem>>
    %c0_2 = arith.constant 0 : index
    %c0_3 = arith.constant 0 : index
    %2 = vector.load %arg3[%c0_2, %c0_3] : memref<2x128xf32, #tpu.memory_space<vmem>>, vector<1x128xf32>
    %3 = vector.broadcast %1 : f32 to vector<1x128xf32>
    %4 = arith.mulf %3, %2 : vector<1x128xf32>
    %5 = vector.broadcast %0 : f32 to vector<1x128xf32>
    %6 = arith.addf %5, %4 : vector<1x128xf32>
    %c0_4 = arith.constant 0 : index
    %c1 = arith.constant 1 : index
    %7 = memref.load %arg1[%c0_4, %c1] : memref<3x2xf32, #tpu.memory_space<smem>>
    %c1_5 = arith.constant 1 : index
    %c0_6 = arith.constant 0 : index
    %8 = vector.load %arg3[%c1_5, %c0_6] : memref<2x128xf32, #tpu.memory_space<vmem>>, vector<1x128xf32>
    %9 = vector.broadcast %7 : f32 to vector<1x128xf32>
    %10 = arith.mulf %9, %8 : vector<1x128xf32>
    %11 = arith.addf %6, %10 : vector<1x128xf32>
    %c1_7 = arith.constant 1 : index
    %12 = memref.load %arg2[%c1_7] : memref<3xf32, #tpu.memory_space<smem>>
    %c1_8 = arith.constant 1 : index
    %c0_9 = arith.constant 0 : index
    %13 = memref.load %arg1[%c1_8, %c0_9] : memref<3x2xf32, #tpu.memory_space<smem>>
    %c0_10 = arith.constant 0 : index
    %c0_11 = arith.constant 0 : index
    %14 = vector.load %arg3[%c0_10, %c0_11] : memref<2x128xf32, #tpu.memory_space<vmem>>, vector<1x128xf32>
    %15 = vector.broadcast %13 : f32 to vector<1x128xf32>
    %16 = arith.mulf %15, %14 : vector<1x128xf32>
    %17 = vector.broadcast %12 : f32 to vector<1x128xf32>
    %18 = arith.addf %17, %16 : vector<1x128xf32>
    %c1_12 = arith.constant 1 : index
    %c1_13 = arith.constant 1 : index
    %19 = memref.load %arg1[%c1_12, %c1_13] : memref<3x2xf32, #tpu.memory_space<smem>>
    %c1_14 = arith.constant 1 : index
    %c0_15 = arith.constant 0 : index
    %20 = vector.load %arg3[%c1_14, %c0_15] : memref<2x128xf32, #tpu.memory_space<vmem>>, vector<1x128xf32>
    %21 = vector.broadcast %19 : f32 to vector<1x128xf32>
    %22 = arith.mulf %21, %20 : vector<1x128xf32>
    %23 = arith.addf %18, %22 : vector<1x128xf32>
    %c2 = arith.constant 2 : index
    %24 = memref.load %arg2[%c2] : memref<3xf32, #tpu.memory_space<smem>>
    %c2_16 = arith.constant 2 : index
    %c0_17 = arith.constant 0 : index
    %25 = memref.load %arg1[%c2_16, %c0_17] : memref<3x2xf32, #tpu.memory_space<smem>>
    %c0_18 = arith.constant 0 : index
    %c0_19 = arith.constant 0 : index
    %26 = vector.load %arg3[%c0_18, %c0_19] : memref<2x128xf32, #tpu.memory_space<vmem>>, vector<1x128xf32>
    %27 = vector.broadcast %25 : f32 to vector<1x128xf32>
    %28 = arith.mulf %27, %26 : vector<1x128xf32>
    %29 = vector.broadcast %24 : f32 to vector<1x128xf32>
    %30 = arith.addf %29, %28 : vector<1x128xf32>
    %c2_20 = arith.constant 2 : index
    %c1_21 = arith.constant 1 : index
    %31 = memref.load %arg1[%c2_20, %c1_21] : memref<3x2xf32, #tpu.memory_space<smem>>
    %c1_22 = arith.constant 1 : index
    %c0_23 = arith.constant 0 : index
    %32 = vector.load %arg3[%c1_22, %c0_23] : memref<2x128xf32, #tpu.memory_space<vmem>>, vector<1x128xf32>
    %33 = vector.broadcast %31 : f32 to vector<1x128xf32>
    %34 = arith.mulf %33, %32 : vector<1x128xf32>
    %35 = arith.addf %30, %34 : vector<1x128xf32>
    %36 = tpu.concatenate %11, %23, %35 in 0 : vector<1x128xf32>, vector<1x128xf32>, vector<1x128xf32> -> vector<3x128xf32>
    %c0_24 = arith.constant 0 : index
    %c0_25 = arith.constant 0 : index
    %37 = vector.load %arg4[%c0_24, %c0_25] : memref<3x128xf32, #tpu.memory_space<vmem>>, vector<3x128xf32>
    tpu.vector_store %arg4[%c0_24, %c0_25], %36 {strides = array<i32>} : memref<3x128xf32, #tpu.memory_space<vmem>>, vector<3x128xf32>,
    return
  }
  func.func @transform_0(%arg0: i32) -> (i32, i32) {
    %c0_i32 = arith.constant 0 : i32
    %c0_i32_0 = arith.constant 0 : i32
    %c0_i32_1 = arith.constant 0 : i32
    return %c0_i32, %c0_i32_0 : i32, i32
  }
  func.func @transform_1(%arg0: i32) -> i32 {
    %c0_i32 = arith.constant 0 : i32
    %c0_i32_0 = arith.constant 0 : i32
    return %c0_i32 : i32
  }
  func.func @transform_2(%arg0: i32) -> (i32, i32) {
    %c0_i32 = arith.constant 0 : i32
    %c0_i32_0 = arith.constant 0 : i32
    return %c0_i32, %arg0 : i32, i32
  }
  func.func @transform_3(%arg0: i32) -> (i32, i32) {
    %c0_i32 = arith.constant 0 : i32
    %c0_i32_0 = arith.constant 0 : i32
    return %c0_i32, %arg0 : i32, i32
  }
}

</mosaic_0001>

<bundles_post_ra>
// kernel: tpu_custom_call.1
= control target key start
LH: loop header
LB: loop body
LE: loop exit
PB: predicated region body
PF: predicated region fallthrough
CT: control target
= control target key end

     0   :  { %8 = vsyncpa [#allocation4], 0  ;;  %s208_s0 = inlined_call_operand.vmem [shape: f32[3,2], index: 0, kind: input, shape index: {}]   ;;  %s209_s1 = inlined_call_operand.vmem [shape: f32[3], index: 1, kind: input, shape index: {}]   ;;  %s210_s2 = inlined_call_operand.vmem [shape: f32[2,128], index: 2, kind: input, shape index: {}]   ;;  %s211_s3 = inlined_call_operand.hbm [shape: f32[3,128], index: 3, kind: output, shape index: {}]  }
   0x1   :  { %9 = vsyncpa [#allocation6], 0 }
   0x2   :  { %10 = vsyncpa [#allocation3], 0  ;;  %s17_s14 = sshll.u32 %s208_s0, 4  ;;  %s27_s17 = sshll.u32 %s209_s1, 4  ;;  %s18_s14 = int_to_ptr.vmem [resolvable:$true] %s17_s14  ;;  %s28_s17 = int_to_ptr.vmem [resolvable:$true] %s27_s17 }
   0x3   :  { %s109_s18 = scalar_lea.vmem %s18_s14, 64  ;;  %p114_p1 = scmp.lt.s32.totalorder %s18_s14, %s18_s14 }
   0x4   :  { %p110_p0 = scmp.ne.s32.totalorder %s18_s14, %s109_s18  ;;  %p115_p2 = scmp.lt.s32.totalorder %s109_s18, %s109_s18 }
   0x6   :  { %p116_p3 = por %p115_p2, %p114_p1 }
   0x8   :  { %p117_p4 = pnand %p116_p3, %p110_p0 }
   0xa   :  { %120 = shalt.err (!%p117_p4)
}
   0xb   :  { %s161_s19 = smov [#allocation2]   ;;  %s121_s20 = scalar_lea.vmem %s28_s17, 16 }
   0xc   :  { %20 = dma.vmem_to_smem %s18_s14, 64, %s161_s19, [#allocation4]  }
   0xd   :  { %p122_p5 = scmp.ne.s32.totalorder %s28_s17, %s121_s20  ;;  %p126_p6 = scmp.lt.s32.totalorder %s28_s17, %s28_s17 }
   0xe   :  { %p127_p7 = scmp.lt.s32.totalorder %s121_s20, %s121_s20 }
  0x10   :  { %p128_p8 = por %p127_p7, %p126_p6 }
  0x12   :  { %p129_p9 = pnand %p128_p8, %p122_p5 }
  0x14   :  { %132 = shalt.err (!%p129_p9)
}
  0x15   :  { %s162_s0 = smov [#allocation5]  }
  0x16   :  { %30 = dma.vmem_to_smem %s28_s17, 16, %s162_s0, [#allocation6]  }
  0x17   :  { %155 = dma.done.wait [#allocation4], 64  }
  0x18   :  { %156 = vsyncadd [#allocation4], 4294967232 }
  0x19   :  { %157 = dma.done.wait [#allocation6], 16  }
  0x1a   :  { %158 = vsyncadd [#allocation6], 4294967280 }
  0x1b   :  { %39 = sfence }
  0x1c   :  { %s40_s1 = sld [smem:[#allocation5]]  ;;  %s99_s22 = sld [smem:[#allocation2 + $0x1]]  ;;  %v42_v0 = vld [vmem:[%s210_s2] sm:$0x1]  ;;  %v48_v3 = vld [vmem:[%s210_s2 + $0x1] sm:$0x1] }
  0x1d   :  { %s41_s21 = sld [smem:[#allocation2]]  ;;  %s100_s23 = sld [smem:[#allocation5 + $0x1]]  ;;  %vm78_vm0 = vcmask 1040384   ;;  %vm80_vm1 = vcmask 1041408  }
  0x1e   :  { %s101_s24 = sld [smem:[#allocation2 + $0x80]]  ;;  %s102_s25 = sld [smem:[#allocation2 + $0x81]] }
  0x1f   :  { %s103_s26 = sld [smem:[#allocation5 + $0x2]]  ;;  %s104_s27 = sld [smem:[#allocation2 + $0x100]] }
  0x20   :  { %s105_s28 = sld [smem:[#allocation2 + $0x101]]  ;;  %s163_s2 = smov [#allocation7]  }
  0x21   :  { %s89_s6 = sshll.u32 %s163_s2, 4  ;;  %s90_s6 = int_to_ptr.vmem [resolvable:$true] %s89_s6 }
  0x22   :  { %v45_v2 = vstv %s40_s1  ;;  %v49_v5 = vstv %s99_s22  ;;  %s133_s7 = scalar_lea.vmem %s90_s6, 64  ;;  %p138_p11 = scmp.lt.s32.totalorder %s90_s6, %s90_s6 }
  0x23   :  { %v43_v1 = vstv %s41_s21  ;;  %v50_v6 = vmul.f32 %v49_v5, %v48_v3  ;;  %v56_v8 = vstv %s100_s23  ;;  %p134_p10 = scmp.ne.s32.totalorder %s90_s6, %s133_s7  ;;  %p139_p12 = scmp.lt.s32.totalorder %s133_s7, %s133_s7 }
  0x24   :  { %v44_v4 = vmul.f32 %v43_v1, %v42_v0  ;;  %v54_v7 = vstv %s101_s24  ;;  %v59_v9 = vstv %s102_s25 }
  0x25   :  { %v55_v11 = vmul.f32 %v54_v7, %v42_v0  ;;  %v60_v12 = vmul.f32 %v59_v9, %v48_v3  ;;  %v64_v13 = vstv %s104_s27  ;;  %v66_v15 = vstv %s103_s26  ;;  %p140_p13 = por %p139_p12, %p138_p11 }
  0x26   :  { %v46_v10 = vadd.f32 %v45_v2, %v44_v4  ;;  %v65_v14 = vmul.f32 %v64_v13, %v42_v0  ;;  %v69_v16 = vstv %s105_s28 }
  0x27   :  { %v57_v17 = vadd.f32 %v56_v8, %v55_v11  ;;  %v70_v18 = vmul.f32 %v69_v16, %v48_v3  ;;  %p141_p0 = pnand %p140_p13, %p134_p10 }
  0x28   :  { %v67_v19 = vadd.f32 %v66_v15, %v65_v14  ;;  %v51_v20 = vadd.f32 %v50_v6, %v46_v10 }
  0x29   :  { %v61_v21 = vadd.f32 %v60_v12, %v57_v17 }
  0x2a   :  { %v71_v22 = vadd.f32 %v70_v18, %v67_v19 }
  0x2b   :  { %v73_v23 = vrot.slane %v61_v21, 7 }
  0x2c   :  { %v76_v24 = vrot.slane %v71_v22, 6 }
  0x2d   :  { %v79_v25 = vsel %vm78_vm0, %v51_v20, %v73_v23 }
  0x2e   :  { %v81_v26 = vsel %vm80_vm1, %v79_v25, %v76_v24 }
  0x2f   :  { %82 = vst [vmem:[#allocation7] sm:$0x7] %v81_v26 }
  0x30   :  { %144 = shalt.err (!%p141_p0)
}
  0x31   :  { %s145_s10 = scalar_lea.hbm %s211_s3, 64 }
  0x32   :  { %p146_p1 = scmp.ne.s32.totalorder %s211_s3, %s145_s10  ;;  %p149_p2 = scmp.lt.u32.totalorder %s145_s10, %s211_s3 }
  0x34   :  { %p151_p3 = pnand %p149_p2, %p146_p1 }
  0x36   :  { %154 = shalt.err (!%p151_p3)
}
  0x37   :  { %92 = dma.vmem_to_hbm [thread:$0]  %s90_s6, 64, %s211_s3, [#allocation3]  }
  0x38   :  { %159 = dma.done.wait [#allocation3], 64  }
  0x39   :  { %160 = vsyncadd [#allocation3], 4294967232 }
  0x3a   :  { %96 = vsyncpa [#allocation3], 1 }
  0x3b   :  { %97 = vsyncpa [#allocation4], 1 }
  0x3c   :  { %98 = vsyncpa [#allocation6], 1 }

</bundles_post_ra>
